<compile_context>
chip_gen: v7x
topology: tpu7x:2x2x1
jax: 0.10.0
libtpu: 0.0.40
codegen_flags: <defaults>
</compile_context>

<pallas_src>
import math
import functools

import jax
import jax.numpy as jnp
from jax.experimental import pallas as pl
from jax.experimental.pallas import tpu as pltpu


def _invariant_spec(shape, index_map):
    """Grid-invariant block: single-buffered (never re-DMA'd, half the VMEM)."""
    try:
        return pl.BlockSpec(shape, index_map, pipeline_mode=pl.Buffered(1))
    except TypeError:  # older jax without pipeline_mode -> default double buffering
        return pl.BlockSpec(shape, index_map)


def _vmem_limit(estimate_bytes):
    # 2x headroom + 4 MiB slack, floored at 32 MiB and capped at 64 MiB (valid on every
    # generation; v7x physical VMEM is 64 MiB per core).
    return int(min(max(2 * estimate_bytes + (4 << 20), 32 << 20), 64 << 20))


# --------------------------------------------------------------------------------------
# Kernel 1: QKV projection into head-major layout.
# --------------------------------------------------------------------------------------
def _qkv_proj_kernel(q_ref, k_ref, v_ref,
                     wq_ref, bq_ref, wk_ref, bk_ref, wv_ref, bv_ref,
                     qh_ref, kh_ref, vh_ref, *, nhead):
    for x_ref, w_ref, b_ref, o_ref in (
            (q_ref, wq_ref, bq_ref, qh_ref),
            (k_ref, wk_ref, bk_ref, kh_ref),
            (v_ref, wv_ref, bv_ref, vh_ref)):
        x = x_ref[0]                                             # (ts, D)
        for h in range(nhead):                                   # direct head-major output
            y = jnp.dot(x, w_ref[h],
                        preferred_element_type=jnp.float32) + b_ref[h]
            o_ref[0, h] = y.astype(o_ref.dtype)                  # (ts, kd) slab store


# --------------------------------------------------------------------------------------
# Kernel 2: attention core (per batch element, per head, per query tile).
# --------------------------------------------------------------------------------------
def _attention_kernel(q_ref, k_ref, v_ref, ctx_ref, *attn_refs, mxu_dtype):
    q = q_ref[0, 0]                                              # (tq, kd)
    k = k_ref[0, 0]                                              # (S,  kd)
    v = v_ref[0, 0]                                              # (S,  kd)

    # Scores; the 1/sqrt(kd) scale is already folded into the Q projection.
    s = jax.lax.dot_general(q, k, (((1,), (1,)), ((), ())),
                            preferred_element_type=jnp.float32)  # (tq, S)
    s = s - jnp.max(s, axis=-1, keepdims=True)
    e = jnp.exp(s)
    inv = 1.0 / jnp.sum(e, axis=-1, keepdims=True)               # exact: rows sum to 1
    p = e * inv

    if attn_refs:                                                # need_weights path
        attn_refs[0][0, 0] = p.astype(attn_refs[0].dtype)
    # TODO(synk): dropout on `p` omitted (eval-mode identity).

    ctx = jnp.dot(p.astype(mxu_dtype), v, preferred_element_type=jnp.float32)
    ctx_ref[0, 0] = ctx.astype(ctx_ref.dtype)                    # (tq, kd)


# --------------------------------------------------------------------------------------
# Kernel 3: output projection (merge heads on the MXU, full-width stores).
# --------------------------------------------------------------------------------------
def _out_proj_kernel(ctx_ref, wo_ref, bo_ref, out_ref, *, nhead):
    acc = jnp.zeros(out_ref.shape[1:], jnp.float32)              # (ts, D) f32 accumulator
    for h in range(nhead):
        acc = acc + jnp.dot(ctx_ref[0, h], wo_ref[h],
                            preferred_element_type=jnp.float32)
    out_ref[0] = (acc + bo_ref[...]).astype(out_ref.dtype)


# --------------------------------------------------------------------------------------
# Wrapper.
# --------------------------------------------------------------------------------------
def multi_head_attention(query, key, value, params, *, nhead,
                         q_tile=None, s_tile=None,
                         mxu_dtype=jnp.bfloat16,
                         attn_dtype=jnp.bfloat16,
                         need_weights=True):
    """query/key/value: (B, S, D).  Returns (output (B,S,D), attn (B,H,S,S) or None)."""
    B, S, D = query.shape
    assert key.shape == (B, S, D) and value.shape == (B, S, D)
    assert D % nhead == 0, "model_dim must be divisible by nhead"
    H = nhead
    kd = D // nhead

    wq, bq, wk, bk, wv, bv, wo, bo = params           # w*: (D, D) as (in, out); b*: (1, D)

    # Fold the softmax scale into the Q projection (zero in-kernel scaling work).
    scale = 1.0 / math.sqrt(kd)
    wq = wq * scale
    bq = bq * scale

    # Head-major parameter layouts (one-time, wrapper-side).
    def to_heads_w(w):                                 # (D, D) -> (H, D, kd)
        return w.reshape(D, H, kd).transpose(1, 0, 2)

    wq_h, wk_h, wv_h = (to_heads_w(w).astype(mxu_dtype) for w in (wq, wk, wv))
    bq_h, bk_h, bv_h = (b.reshape(H, 1, kd).astype(jnp.float32) for b in (bq, bk, bv))
    wo_h = wo.reshape(H, kd, D).astype(mxu_dtype)      # (H, kd, D)
    bo_f = bo.astype(jnp.float32)

    q_in, k_in, v_in = (x.astype(mxu_dtype) for x in (query, key, value))

    if s_tile is None:
        s_tile = 128 if S % 128 == 0 else S
    if q_tile is None:
        q_tile = 128 if S % 128 == 0 else S
    assert S % s_tile == 0 and S % q_tile == 0
    n_s = S // s_tile
    n_q = S // q_tile

    m_bytes = jnp.dtype(mxu_dtype).itemsize
    a_bytes = jnp.dtype(attn_dtype).itemsize
    o_bytes = jnp.dtype(query.dtype).itemsize
    ctx_dtype = mxu_dtype

    # ---------------- Kernel 1: QKV head projection ----------------
    proj_vmem = (3 * 2 * s_tile * D * m_bytes          # q/k/v input blocks (double-buffered)
                 + 3 * (D * D * m_bytes + D * 4)       # single-buffered weights + biases
                 + 3 * 2 * s_tile * D * m_bytes        # head-major output blocks
                 + 4 * s_tile * D * 4)                 # f32 intermediates
    qh, kh, vh = pl.pallas_call(
        functools.partial(_qkv_proj_kernel, nhead=H),
        grid=(B, n_s),
        in_specs=[
            pl.BlockSpec((1, s_tile, D), lambda b, si: (b, si, 0)),   # query
            pl.BlockSpec((1, s_tile, D), lambda b, si: (b, si, 0)),   # key
            pl.BlockSpec((1, s_tile, D), lambda b, si: (b, si, 0)),   # value
            _invariant_spec((H, D, kd), lambda b, si: (0, 0, 0)),     # wq heads
            _invariant_spec((H, 1, kd), lambda b, si: (0, 0, 0)),     # bq heads
            _invariant_spec((H, D, kd), lambda b, si: (0, 0, 0)),     # wk heads
            _invariant_spec((H, 1, kd), lambda b, si: (0, 0, 0)),     # bk heads
            _invariant_spec((H, D, kd), lambda b, si: (0, 0, 0)),     # wv heads
            _invariant_spec((H, 1, kd), lambda b, si: (0, 0, 0)),     # bv heads
        ],
        out_specs=[
            pl.BlockSpec((1, H, s_tile, kd), lambda b, si: (b, 0, si, 0)),
            pl.BlockSpec((1, H, s_tile, kd), lambda b, si: (b, 0, si, 0)),
            pl.BlockSpec((1, H, s_tile, kd), lambda b, si: (b, 0, si, 0)),
        ],
        out_shape=[jax.ShapeDtypeStruct((B, H, S, kd), mxu_dtype)] * 3,
        compiler_params=pltpu.CompilerParams(
            dimension_semantics=("parallel", "parallel"),
            vmem_limit_bytes=_vmem_limit(proj_vmem)),
    )(q_in, k_in, v_in, wq_h, bq_h, wk_h, bk_h, wv_h, bv_h)

    # ---------------- Kernel 2: attention core ----------------
    attn_vmem = (2 * q_tile * kd * m_bytes             # Q tile
                 + 2 * 2 * S * kd * m_bytes            # K, V head blocks
                 + 2 * q_tile * kd * m_bytes           # ctx output block
                 + (2 * q_tile * S * a_bytes if need_weights else 0)   # attn output block
                 + 4 * q_tile * S * 4)                 # f32 scores/exp/probs intermediates

    out_shapes = [jax.ShapeDtypeStruct((B, H, S, kd), ctx_dtype)]
    out_specs = [pl.BlockSpec((1, 1, q_tile, kd), lambda b, h, qi: (b, h, qi, 0))]
    if need_weights:
        out_shapes.append(jax.ShapeDtypeStruct((B, H, S, S), attn_dtype))
        out_specs.append(pl.BlockSpec((1, 1, q_tile, S), lambda b, h, qi: (b, h, qi, 0)))

    attn_cost = pl.CostEstimate(
        flops=4 * B * H * S * S * kd,                  # QK^T + PV
        transcendentals=B * H * S * S,                 # exp
        bytes_accessed=(3 * B * H * S * kd * m_bytes
                        + B * H * S * kd * jnp.dtype(ctx_dtype).itemsize
                        + (B * H * S * S * a_bytes if need_weights else 0)))

    results = pl.pallas_call(
        functools.partial(_attention_kernel, mxu_dtype=mxu_dtype),
        grid=(B, H, n_q),
        in_specs=[
            pl.BlockSpec((1, 1, q_tile, kd), lambda b, h, qi: (b, h, qi, 0)),  # Q heads
            pl.BlockSpec((1, 1, S, kd), lambda b, h, qi: (b, h, 0, 0)),        # K heads
            pl.BlockSpec((1, 1, S, kd), lambda b, h, qi: (b, h, 0, 0)),        # V heads
        ],
        out_specs=out_specs,
        out_shape=out_shapes,
        compiler_params=pltpu.CompilerParams(
            dimension_semantics=("parallel", "parallel", "parallel"),
            vmem_limit_bytes=_vmem_limit(attn_vmem)),
        cost_estimate=attn_cost,
    )(qh, kh, vh)

    if need_weights:
        ctx, attn = results
    else:
        (ctx,) = results
        attn = None

    # ---------------- Kernel 3: output projection ----------------
    outp_vmem = (2 * s_tile * D * jnp.dtype(ctx_dtype).itemsize   # ctx block
                 + D * D * m_bytes + D * 4                        # wo + bo (single-buffered)
                 + 2 * s_tile * D * o_bytes                       # output block
                 + 2 * s_tile * D * 4)                            # f32 accumulator
    out = pl.pallas_call(
        functools.partial(_out_proj_kernel, nhead=H),
        grid=(B, n_s),
        in_specs=[
            pl.BlockSpec((1, H, s_tile, kd), lambda b, si: (b, 0, si, 0)),   # ctx heads
            _invariant_spec((H, kd, D), lambda b, si: (0, 0, 0)),            # wo heads
            _invariant_spec((1, D), lambda b, si: (0, 0)),                   # bo
        ],
        out_specs=pl.BlockSpec((1, s_tile, D), lambda b, si: (b, si, 0)),
        out_shape=jax.ShapeDtypeStruct((B, S, D), query.dtype),
        compiler_params=pltpu.CompilerParams(
            dimension_semantics=("parallel", "parallel"),
            vmem_limit_bytes=_vmem_limit(outp_vmem)),
    )(ctx, wo_h, bo_f)

    return out, attn


# --------------------------------------------------------------------------------------
# Pure-JAX reference (same math as the PyTorch module's forward).
# --------------------------------------------------------------------------------------
def _reference(query, key, value, params, *, nhead):
    B, S, D = query.shape
    kd = D // nhead
    wq, bq, wk, bk, wv, bv, wo, bo = params

    def proj(x, w, b):
        y = x @ w + b                                            # (B, S, D)
        return y.reshape(B, S, nhead, kd).transpose(0, 2, 1, 3)  # (B, H, S, kd)

    Q, K, V = proj(query, wq, bq), proj(key, wk, bk), proj(value, wv, bv)
    scores = jnp.einsum('bhqd,bhkd->bhqk', Q, K) / math.sqrt(kd)
    attn = jax.nn.softmax(scores, axis=-1)
    ctx = jnp.einsum('bhqk,bhkd->bhqd', attn, V).transpose(0, 2, 1, 3).reshape(B, S, D)
    out = ctx @ wo + bo
    return out, attn


if __name__ == "__main__":
    B, S, D, H = 2, 8, 32, 4   # batch, seq, model_dim, nhead

    key0 = jax.random.PRNGKey(0)
    keys = jax.random.split(key0, 11)
    scale = 1.0 / math.sqrt(D)

    # Deterministic synthetic parameters (weights stored as (in, out), bias (1, D)).
    wq = jax.random.normal(keys[0], (D, D), jnp.float32) * scale
    bq = jax.random.normal(keys[1], (1, D), jnp.float32) * scale
    wk = jax.random.normal(keys[2], (D, D), jnp.float32) * scale
    bk = jax.random.normal(keys[3], (1, D), jnp.float32) * scale
    wv = jax.random.normal(keys[4], (D, D), jnp.float32) * scale
    bv = jax.random.normal(keys[5], (1, D), jnp.float32) * scale
    wo = jax.random.normal(keys[6], (D, D), jnp.float32) * scale
    bo = jax.random.normal(keys[7], (1, D), jnp.float32) * scale
    params = (wq, bq, wk, bk, wv, bv, wo, bo)

    query = jax.random.normal(keys[8], (B, S, D), jnp.float32)
    key_in = jax.random.normal(keys[9], (B, S, D), jnp.float32)
    value = jax.random.normal(keys[10], (B, S, D), jnp.float32)

    out_exp, attn_exp = _reference(query, key_in, value, params, nhead=H)

    # f32 MXU path + f32 attn: tight numerical check against the pure-JAX reference.
    out32, attn32 = multi_head_attention(query, key_in, value, params, nhead=H,
                                         mxu_dtype=jnp.float32, attn_dtype=jnp.float32)
    (out32, attn32) = jax.block_until_ready((out32, attn32))
    assert out32.shape == (B, S, D) and attn32.shape == (B, H, S, S)
    assert jnp.allclose(out32, out_exp, atol=5e-3, rtol=5e-3)
    assert jnp.allclose(attn32, attn_exp, atol=5e-3, rtol=5e-3)

    # Default (recommended) path: bf16 MXU inputs + bf16 attn writeback, f32 accumulation.
    out16, attn16 = multi_head_attention(query, key_in, value, params, nhead=H)
    (out16, attn16) = jax.block_until_ready((out16, attn16))
    assert out16.dtype == query.dtype and attn16.dtype == jnp.bfloat16
    assert jnp.allclose(out16, out_exp, atol=7.5e-2, rtol=7.5e-2)
    assert jnp.allclose(attn16.astype(jnp.float32), attn_exp, atol=7.5e-2, rtol=7.5e-2)

    # need_weights=False path (skips the O(B*H*S^2) attn writeback entirely).
    out_nw, attn_nw = multi_head_attention(query, key_in, value, params, nhead=H,
                                           need_weights=False)
    out_nw = jax.block_until_ready(out_nw)
    assert attn_nw is None
    assert jnp.allclose(out_nw, out16, atol=1e-6, rtol=1e-6)

    print("KERNEL_OK")
</pallas_src>

<mosaic_0001>
module attributes {stable_mosaic.version = 11 : i64} {
  func.func @_qkv_proj_kernel(%arg0: i32, %arg1: i32, %arg2: memref<1x8x32xf32, #tpu.memory_space<vmem>>, %arg3: memref<1x8x32xf32, #tpu.memory_space<vmem>>, %arg4: memref<1x8x32xf32, #tpu.memory_space<vmem>>, %arg5: memref<4x32x8xf32, #tpu.memory_space<vmem>>, %arg6: memref<4x1x8xf32, #tpu.memory_space<vmem>>, %arg7: memref<4x32x8xf32, #tpu.memory_space<vmem>>, %arg8: memref<4x1x8xf32, #tpu.memory_space<vmem>>, %arg9: memref<4x32x8xf32, #tpu.memory_space<vmem>>, %arg10: memref<4x1x8xf32, #tpu.memory_space<vmem>>, %arg11: memref<1x4x8x8xf32, #tpu.memory_space<vmem>>, %arg12: memref<1x4x8x8xf32, #tpu.memory_space<vmem>>, %arg13: memref<1x4x8x8xf32, #tpu.memory_space<vmem>>) attributes {dimension_semantics = [#tpu.dimension_semantics<parallel>, #tpu.dimension_semantics<parallel>], iteration_bounds = array<i64: 2, 1>, scalar_prefetch = 0 : i64, scratch_operands = 0 : i64, tpu.core_type = #tpu.core_type<tc>, window_params = [{transform_indices = @transform_0, window_bounds = array<i64: 1, 8, 32>}, {transform_indices = @transform_1, window_bounds = array<i64: 1, 8, 32>}, {transform_indices = @transform_2, window_bounds = array<i64: 1, 8, 32>}, {pipeline_mode = #tpu.pipeline_mode<synchronous>, transform_indices = @transform_3, window_bounds = array<i64: 4, 32, 8>}, {pipeline_mode = #tpu.pipeline_mode<synchronous>, transform_indices = @transform_4, window_bounds = array<i64: 4, 1, 8>}, {pipeline_mode = #tpu.pipeline_mode<synchronous>, transform_indices = @transform_5, window_bounds = array<i64: 4, 32, 8>}, {pipeline_mode = #tpu.pipeline_mode<synchronous>, transform_indices = @transform_6, window_bounds = array<i64: 4, 1, 8>}, {pipeline_mode = #tpu.pipeline_mode<synchronous>, transform_indices = @transform_7, window_bounds = array<i64: 4, 32, 8>}, {pipeline_mode = #tpu.pipeline_mode<synchronous>, transform_indices = @transform_8, window_bounds = array<i64: 4, 1, 8>}, {transform_indices = @transform_9, window_bounds = array<i64: 1, 4, 8, 8>}, {transform_indices = @transform_10, window_bounds = array<i64: 1, 4, 8, 8>}, {transform_indices = @transform_11, window_bounds = array<i64: 1, 4, 8, 8>}]} {
    %c0 = arith.constant 0 : index
    %c0_0 = arith.constant 0 : index
    %c0_1 = arith.constant 0 : index
    %0 = vector.load %arg2[%c0, %c0_0, %c0_1] : memref<1x8x32xf32, #tpu.memory_space<vmem>>, vector<1x8x32xf32>
    %1 = vector.shape_cast %0 : vector<1x8x32xf32> to vector<8x32xf32>
    %c0_2 = arith.constant 0 : index
    %c0_3 = arith.constant 0 : index
    %c0_4 = arith.constant 0 : index
    %2 = vector.load %arg5[%c0_2, %c0_3, %c0_4] : memref<4x32x8xf32, #tpu.memory_space<vmem>>, vector<1x32x8xf32>
    %3 = vector.shape_cast %2 : vector<1x32x8xf32> to vector<32x8xf32>
    %cst = arith.constant dense<0.000000e+00> : vector<8x8xf32>
    %4 = tpu.matmul %1, %3, %cst {dimension_numbers = #tpu.dot_dimension_numbers<[1], [0], [0], [1], [0, 0, 1, 1], [], []>} : vector<8x32xf32>, vector<32x8xf32>, vector<8x8xf32> -> vector<8x8xf32>
    %c0_5 = arith.constant 0 : index
    %c0_6 = arith.constant 0 : index
    %c0_7 = arith.constant 0 : index
    %5 = vector.load %arg6[%c0_5, %c0_6, %c0_7] : memref<4x1x8xf32, #tpu.memory_space<vmem>>, vector<1x1x8xf32>
    %6 = vector.shape_cast %5 : vector<1x1x8xf32> to vector<1x8xf32>
    %7 = vector.broadcast %6 : vector<1x8xf32> to vector<8x8xf32>
    %8 = arith.addf %4, %7 : vector<8x8xf32>
    %c0_8 = arith.constant 0 : index
    %c0_9 = arith.constant 0 : index
    %c0_10 = arith.constant 0 : index
    %c0_11 = arith.constant 0 : index
    %9 = vector.load %arg11[%c0_8, %c0_9, %c0_10, %c0_11] : memref<1x4x8x8xf32, #tpu.memory_space<vmem>>, vector<1x1x8x8xf32>
    %10 = vector.shape_cast %9 : vector<1x1x8x8xf32> to vector<8x8xf32>
    %11 = vector.shape_cast %8 : vector<8x8xf32> to vector<1x1x8x8xf32>
    tpu.vector_store %arg11[%c0_8, %c0_9, %c0_10, %c0_11], %11 {strides = array<i32>} : memref<1x4x8x8xf32, #tpu.memory_space<vmem>>, vector<1x1x8x8xf32>,
    %c1 = arith.constant 1 : index
    %c0_12 = arith.constant 0 : index
    %c0_13 = arith.constant 0 : index
    %12 = vector.load %arg5[%c1, %c0_12, %c0_13] : memref<4x32x8xf32, #tpu.memory_space<vmem>>, vector<1x32x8xf32>
    %13 = vector.shape_cast %12 : vector<1x32x8xf32> to vector<32x8xf32>
    %cst_14 = arith.constant dense<0.000000e+00> : vector<8x8xf32>
    %14 = tpu.matmul %1, %13, %cst_14 {dimension_numbers = #tpu.dot_dimension_numbers<[1], [0], [0], [1], [0, 0, 1, 1], [], []>} : vector<8x32xf32>, vector<32x8xf32>, vector<8x8xf32> -> vector<8x8xf32>
    %c1_15 = arith.constant 1 : index
    %c0_16 = arith.constant 0 : index
    %c0_17 = arith.constant 0 : index
    %15 = vector.load %arg6[%c1_15, %c0_16, %c0_17] : memref<4x1x8xf32, #tpu.memory_space<vmem>>, vector<1x1x8xf32>
    %16 = vector.shape_cast %15 : vector<1x1x8xf32> to vector<1x8xf32>
    %17 = vector.broadcast %16 : vector<1x8xf32> to vector<8x8xf32>
    %18 = arith.addf %14, %17 : vector<8x8xf32>
    %c0_18 = arith.constant 0 : index
    %c1_19 = arith.constant 1 : index
    %c0_20 = arith.constant 0 : index
    %c0_21 = arith.constant 0 : index
    %19 = vector.load %arg11[%c0_18, %c1_19, %c0_20, %c0_21] : memref<1x4x8x8xf32, #tpu.memory_space<vmem>>, vector<1x1x8x8xf32>
    %20 = vector.shape_cast %19 : vector<1x1x8x8xf32> to vector<8x8xf32>
    %21 = vector.shape_cast %18 : vector<8x8xf32> to vector<1x1x8x8xf32>
    tpu.vector_store %arg11[%c0_18, %c1_19, %c0_20, %c0_21], %21 {strides = array<i32>} : memref<1x4x8x8xf32, #tpu.memory_space<vmem>>, vector<1x1x8x8xf32>,
    %c2 = arith.constant 2 : index
    %c0_22 = arith.constant 0 : index
    %c0_23 = arith.constant 0 : index
    %22 = vector.load %arg5[%c2, %c0_22, %c0_23] : memref<4x32x8xf32, #tpu.memory_space<vmem>>, vector<1x32x8xf32>
    %23 = vector.shape_cast %22 : vector<1x32x8xf32> to vector<32x8xf32>
    %cst_24 = arith.constant dense<0.000000e+00> : vector<8x8xf32>
    %24 = tpu.matmul %1, %23, %cst_24 {dimension_numbers = #tpu.dot_dimension_numbers<[1], [0], [0], [1], [0, 0, 1, 1], [], []>} : vector<8x32xf32>, vector<32x8xf32>, vector<8x8xf32> -> vector<8x8xf32>
    %c2_25 = arith.constant 2 : index
    %c0_26 = arith.constant 0 : index
    %c0_27 = arith.constant 0 : index
    %25 = vector.load %arg6[%c2_25, %c0_26, %c0_27] : memref<4x1x8xf32, #tpu.memory_space<vmem>>, vector<1x1x8xf32>
    %26 = vector.shape_cast %25 : vector<1x1x8xf32> to vector<1x8xf32>
    %27 = vector.broadcast %26 : vector<1x8xf32> to vector<8x8xf32>
    %28 = arith.addf %24, %27 : vector<8x8xf32>
    %c0_28 = arith.constant 0 : index
    %c2_29 = arith.constant 2 : index
    %c0_30 = arith.constant 0 : index
    %c0_31 = arith.constant 0 : index
    %29 = vector.load %arg11[%c0_28, %c2_29, %c0_30, %c0_31] : memref<1x4x8x8xf32, #tpu.memory_space<vmem>>, vector<1x1x8x8xf32>
    %30 = vector.shape_cast %29 : vector<1x1x8x8xf32> to vector<8x8xf32>
    %31 = vector.shape_cast %28 : vector<8x8xf32> to vector<1x1x8x8xf32>
    tpu.vector_store %arg11[%c0_28, %c2_29, %c0_30, %c0_31], %31 {strides = array<i32>} : memref<1x4x8x8xf32, #tpu.memory_space<vmem>>, vector<1x1x8x8xf32>,
    %c3 = arith.constant 3 : index
    %c0_32 = arith.constant 0 : index
    %c0_33 = arith.constant 0 : index
    %32 = vector.load %arg5[%c3, %c0_32, %c0_33] : memref<4x32x8xf32, #tpu.memory_space<vmem>>, vector<1x32x8xf32>
    %33 = vector.shape_cast %32 : vector<1x32x8xf32> to vector<32x8xf32>
    %cst_34 = arith.constant dense<0.000000e+00> : vector<8x8xf32>
    %34 = tpu.matmul %1, %33, %cst_34 {dimension_numbers = #tpu.dot_dimension_numbers<[1], [0], [0], [1], [0, 0, 1, 1], [], []>} : vector<8x32xf32>, vector<32x8xf32>, vector<8x8xf32> -> vector<8x8xf32>
    %c3_35 = arith.constant 3 : index
    %c0_36 = arith.constant 0 : index
    %c0_37 = arith.constant 0 : index
    %35 = vector.load %arg6[%c3_35, %c0_36, %c0_37] : memref<4x1x8xf32, #tpu.memory_space<vmem>>, vector<1x1x8xf32>
    %36 = vector.shape_cast %35 : vector<1x1x8xf32> to vector<1x8xf32>
    %37 = vector.broadcast %36 : vector<1x8xf32> to vector<8x8xf32>
    %38 = arith.addf %34, %37 : vector<8x8xf32>
    %c0_38 = arith.constant 0 : index
    %c3_39 = arith.constant 3 : index
    %c0_40 = arith.constant 0 : index
    %c0_41 = arith.constant 0 : index
    %39 = vector.load %arg11[%c0_38, %c3_39, %c0_40, %c0_41] : memref<1x4x8x8xf32, #tpu.memory_space<vmem>>, vector<1x1x8x8xf32>
    %40 = vector.shape_cast %39 : vector<1x1x8x8xf32> to vector<8x8xf32>
    %41 = vector.shape_cast %38 : vector<8x8xf32> to vector<1x1x8x8xf32>
    tpu.vector_store %arg11[%c0_38, %c3_39, %c0_40, %c0_41], %41 {strides = array<i32>} : memref<1x4x8x8xf32, #tpu.memory_space<vmem>>, vector<1x1x8x8xf32>,
    %c0_42 = arith.constant 0 : index
    %c0_43 = arith.constant 0 : index
    %c0_44 = arith.constant 0 : index
    %42 = vector.load %arg3[%c0_42, %c0_43, %c0_44] : memref<1x8x32xf32, #tpu.memory_space<vmem>>, vector<1x8x32xf32>
    %43 = vector.shape_cast %42 : vector<1x8x32xf32> to vector<8x32xf32>
    %c0_45 = arith.constant 0 : index
    %c0_46 = arith.constant 0 : index
    %c0_47 = arith.constant 0 : index
    %44 = vector.load %arg7[%c0_45, %c0_46, %c0_47] : memref<4x32x8xf32, #tpu.memory_space<vmem>>, vector<1x32x8xf32>
    %45 = vector.shape_cast %44 : vector<1x32x8xf32> to vector<32x8xf32>
    %cst_48 = arith.constant dense<0.000000e+00> : vector<8x8xf32>
    %46 = tpu.matmul %43, %45, %cst_48 {dimension_numbers = #tpu.dot_dimension_numbers<[1], [0], [0], [1], [0, 0, 1, 1], [], []>} : vector<8x32xf32>, vector<32x8xf32>, vector<8x8xf32> -> vector<8x8xf32>
    %c0_49 = arith.constant 0 : index
    %c0_50 = arith.constant 0 : index
    %c0_51 = arith.constant 0 : index
    %47 = vector.load %arg8[%c0_49, %c0_50, %c0_51] : memref<4x1x8xf32, #tpu.memory_space<vmem>>, vector<1x1x8xf32>
    %48 = vector.shape_cast %47 : vector<1x1x8xf32> to vector<1x8xf32>
    %49 = vector.broadcast %48 : vector<1x8xf32> to vector<8x8xf32>
    %50 = arith.addf %46, %49 : vector<8x8xf32>
    %c0_52 = arith.constant 0 : index
    %c0_53 = arith.constant 0 : index
    %c0_54 = arith.constant 0 : index
    %c0_55 = arith.constant 0 : index
    %51 = vector.load %arg12[%c0_52, %c0_53, %c0_54, %c0_55] : memref<1x4x8x8xf32, #tpu.memory_space<vmem>>, vector<1x1x8x8xf32>
    %52 = vector.shape_cast %51 : vector<1x1x8x8xf32> to vector<8x8xf32>
    %53 = vector.shape_cast %50 : vector<8x8xf32> to vector<1x1x8x8xf32>
    tpu.vector_store %arg12[%c0_52, %c0_53, %c0_54, %c0_55], %53 {strides = array<i32>} : memref<1x4x8x8xf32, #tpu.memory_space<vmem>>, vector<1x1x8x8xf32>,
    %c1_56 = arith.constant 1 : index
    %c0_57 = arith.constant 0 : index
    %c0_58 = arith.constant 0 : index
    %54 = vector.load %arg7[%c1_56, %c0_57, %c0_58] : memref<4x32x8xf32, #tpu.memory_space<vmem>>, vector<1x32x8xf32>
    %55 = vector.shape_cast %54 : vector<1x32x8xf32> to vector<32x8xf32>
    %cst_59 = arith.constant dense<0.000000e+00> : vector<8x8xf32>
    %56 = tpu.matmul %43, %55, %cst_59 {dimension_numbers = #tpu.dot_dimension_numbers<[1], [0], [0], [1], [0, 0, 1, 1], [], []>} : vector<8x32xf32>, vector<32x8xf32>, vector<8x8xf32> -> vector<8x8xf32>
    %c1_60 = arith.constant 1 : index
    %c0_61 = arith.constant 0 : index
    %c0_62 = arith.constant 0 : index
    %57 = vector.load %arg8[%c1_60, %c0_61, %c0_62] : memref<4x1x8xf32, #tpu.memory_space<vmem>>, vector<1x1x8xf32>
    %58 = vector.shape_cast %57 : vector<1x1x8xf32> to vector<1x8xf32>
    %59 = vector.broadcast %58 : vector<1x8xf32> to vector<8x8xf32>
    %60 = arith.addf %56, %59 : vector<8x8xf32>
    %c0_63 = arith.constant 0 : index
    %c1_64 = arith.constant 1 : index
    %c0_65 = arith.constant 0 : index
    %c0_66 = arith.constant 0 : index
    %61 = vector.load %arg12[%c0_63, %c1_64, %c0_65, %c0_66] : memref<1x4x8x8xf32, #tpu.memory_space<vmem>>, vector<1x1x8x8xf32>
    %62 = vector.shape_cast %61 : vector<1x1x8x8xf32> to vector<8x8xf32>
    %63 = vector.shape_cast %60 : vector<8x8xf32> to vector<1x1x8x8xf32>
    tpu.vector_store %arg12[%c0_63, %c1_64, %c0_65, %c0_66], %63 {strides = array<i32>} : memref<1x4x8x8xf32, #tpu.memory_space<vmem>>, vector<1x1x8x8xf32>,
    %c2_67 = arith.constant 2 : index
    %c0_68 = arith.constant 0 : index
    %c0_69 = arith.constant 0 : index
    %64 = vector.load %arg7[%c2_67, %c0_68, %c0_69] : memref<4x32x8xf32, #tpu.memory_space<vmem>>, vector<1x32x8xf32>
    %65 = vector.shape_cast %64 : vector<1x32x8xf32> to vector<32x8xf32>
    %cst_70 = arith.constant dense<0.000000e+00> : vector<8x8xf32>
    %66 = tpu.matmul %43, %65, %cst_70 {dimension_numbers = #tpu.dot_dimension_numbers<[1], [0], [0], [1], [0, 0, 1, 1], [], []>} : vector<8x32xf32>, vector<32x8xf32>, vector<8x8xf32> -> vector<8x8xf32>
    %c2_71 = arith.constant 2 : index
    %c0_72 = arith.constant 0 : index
    %c0_73 = arith.constant 0 : index
    %67 = vector.load %arg8[%c2_71, %c0_72, %c0_73] : memref<4x1x8xf32, #tpu.memory_space<vmem>>, vector<1x1x8xf32>
    %68 = vector.shape_cast %67 : vector<1x1x8xf32> to vector<1x8xf32>
    %69 = vector.broadcast %68 : vector<1x8xf32> to vector<8x8xf32>
    %70 = arith.addf %66, %69 : vector<8x8xf32>
    %c0_74 = arith.constant 0 : index
    %c2_75 = arith.constant 2 : index
    %c0_76 = arith.constant 0 : index
    %c0_77 = arith.constant 0 : index
    %71 = vector.load %arg12[%c0_74, %c2_75, %c0_76, %c0_77] : memref<1x4x8x8xf32, #tpu.memory_space<vmem>>, vector<1x1x8x8xf32>
    %72 = vector.shape_cast %71 : vector<1x1x8x8xf32> to vector<8x8xf32>
    %73 = vector.shape_cast %70 : vector<8x8xf32> to vector<1x1x8x8xf32>
    tpu.vector_store %arg12[%c0_74, %c2_75, %c0_76, %c0_77], %73 {strides = array<i32>} : memref<1x4x8x8xf32, #tpu.memory_space<vmem>>, vector<1x1x8x8xf32>,
    %c3_78 = arith.constant 3 : index
    %c0_79 = arith.constant 0 : index
    %c0_80 = arith.constant 0 : index
    %74 = vector.load %arg7[%c3_78, %c0_79, %c0_80] : memref<4x32x8xf32, #tpu.memory_space<vmem>>, vector<1x32x8xf32>
    %75 = vector.shape_cast %74 : vector<1x32x8xf32> to vector<32x8xf32>
    %cst_81 = arith.constant dense<0.000000e+00> : vector<8x8xf32>
    %76 = tpu.matmul %43, %75, %cst_81 {dimension_numbers = #tpu.dot_dimension_numbers<[1], [0], [0], [1], [0, 0, 1, 1], [], []>} : vector<8x32xf32>, vector<32x8xf32>, vector<8x8xf32> -> vector<8x8xf32>
    %c3_82 = arith.constant 3 : index
    %c0_83 = arith.constant 0 : index
    %c0_84 = arith.constant 0 : index
    %77 = vector.load %arg8[%c3_82, %c0_83, %c0_84] : memref<4x1x8xf32, #tpu.memory_space<vmem>>, vector<1x1x8xf32>
    %78 = vector.shape_cast %77 : vector<1x1x8xf32> to vector<1x8xf32>
    %79 = vector.broadcast %78 : vector<1x8xf32> to vector<8x8xf32>
    %80 = arith.addf %76, %79 : vector<8x8xf32>
    %c0_85 = arith.constant 0 : index
    %c3_86 = arith.constant 3 : index
    %c0_87 = arith.constant 0 : index
    %c0_88 = arith.constant 0 : index
    %81 = vector.load %arg12[%c0_85, %c3_86, %c0_87, %c0_88] : memref<1x4x8x8xf32, #tpu.memory_space<vmem>>, vector<1x1x8x8xf32>
    %82 = vector.shape_cast %81 : vector<1x1x8x8xf32> to vector<8x8xf32>
    %83 = vector.shape_cast %80 : vector<8x8xf32> to vector<1x1x8x8xf32>
    tpu.vector_store %arg12[%c0_85, %c3_86, %c0_87, %c0_88], %83 {strides = array<i32>} : memref<1x4x8x8xf32, #tpu.memory_space<vmem>>, vector<1x1x8x8xf32>,
    %c0_89 = arith.constant 0 : index
    %c0_90 = arith.constant 0 : index
    %c0_91 = arith.constant 0 : index
    %84 = vector.load %arg4[%c0_89, %c0_90, %c0_91] : memref<1x8x32xf32, #tpu.memory_space<vmem>>, vector<1x8x32xf32>
    %85 = vector.shape_cast %84 : vector<1x8x32xf32> to vector<8x32xf32>
    %c0_92 = arith.constant 0 : index
    %c0_93 = arith.constant 0 : index
    %c0_94 = arith.constant 0 : index
    %86 = vector.load %arg9[%c0_92, %c0_93, %c0_94] : memref<4x32x8xf32, #tpu.memory_space<vmem>>, vector<1x32x8xf32>
    %87 = vector.shape_cast %86 : vector<1x32x8xf32> to vector<32x8xf32>
    %cst_95 = arith.constant dense<0.000000e+00> : vector<8x8xf32>
    %88 = tpu.matmul %85, %87, %cst_95 {dimension_numbers = #tpu.dot_dimension_numbers<[1], [0], [0], [1], [0, 0, 1, 1], [], []>} : vector<8x32xf32>, vector<32x8xf32>, vector<8x8xf32> -> vector<8x8xf32>
    %c0_96 = arith.constant 0 : index
    %c0_97 = arith.constant 0 : index
    %c0_98 = arith.constant 0 : index
    %89 = vector.load %arg10[%c0_96, %c0_97, %c0_98] : memref<4x1x8xf32, #tpu.memory_space<vmem>>, vector<1x1x8xf32>
    %90 = vector.shape_cast %89 : vector<1x1x8xf32> to vector<1x8xf32>
    %91 = vector.broadcast %90 : vector<1x8xf32> to vector<8x8xf32>
    %92 = arith.addf %88, %91 : vector<8x8xf32>
    %c0_99 = arith.constant 0 : index
    %c0_100 = arith.constant 0 : index
    %c0_101 = arith.constant 0 : index
    %c0_102 = arith.constant 0 : index
    %93 = vector.load %arg13[%c0_99, %c0_100, %c0_101, %c0_102] : memref<1x4x8x8xf32, #tpu.memory_space<vmem>>, vector<1x1x8x8xf32>
    %94 = vector.shape_cast %93 : vector<1x1x8x8xf32> to vector<8x8xf32>
    %95 = vector.shape_cast %92 : vector<8x8xf32> to vector<1x1x8x8xf32>
    tpu.vector_store %arg13[%c0_99, %c0_100, %c0_101, %c0_102], %95 {strides = array<i32>} : memref<1x4x8x8xf32, #tpu.memory_space<vmem>>, vector<1x1x8x8xf32>,
    %c1_103 = arith.constant 1 : index
    %c0_104 = arith.constant 0 : index
    %c0_105 = arith.constant 0 : index
    %96 = vector.load %arg9[%c1_103, %c0_104, %c0_105] : memref<4x32x8xf32, #tpu.memory_space<vmem>>, vector<1x32x8xf32>
    %97 = vector.shape_cast %96 : vector<1x32x8xf32> to vector<32x8xf32>
    %cst_106 = arith.constant dense<0.000000e+00> : vector<8x8xf32>
    %98 = tpu.matmul %85, %97, %cst_106 {dimension_numbers = #tpu.dot_dimension_numbers<[1], [0], [0], [1], [0, 0, 1, 1], [], []>} : vector<8x32xf32>, vector<32x8xf32>, vector<8x8xf32> -> vector<8x8xf32>
    %c1_107 = arith.constant 1 : index
    %c0_108 = arith.constant 0 : index
    %c0_109 = arith.constant 0 : index
    %99 = vector.load %arg10[%c1_107, %c0_108, %c0_109] : memref<4x1x8xf32, #tpu.memory_space<vmem>>, vector<1x1x8xf32>
    %100 = vector.shape_cast %99 : vector<1x1x8xf32> to vector<1x8xf32>
    %101 = vector.broadcast %100 : vector<1x8xf32> to vector<8x8xf32>
    %102 = arith.addf %98, %101 : vector<8x8xf32>
    %c0_110 = arith.constant 0 : index
    %c1_111 = arith.constant 1 : index
    %c0_112 = arith.constant 0 : index
    %c0_113 = arith.constant 0 : index
    %103 = vector.load %arg13[%c0_110, %c1_111, %c0_112, %c0_113] : memref<1x4x8x8xf32, #tpu.memory_space<vmem>>, vector<1x1x8x8xf32>
    %104 = vector.shape_cast %103 : vector<1x1x8x8xf32> to vector<8x8xf32>
    %105 = vector.shape_cast %102 : vector<8x8xf32> to vector<1x1x8x8xf32>
    tpu.vector_store %arg13[%c0_110, %c1_111, %c0_112, %c0_113], %105 {strides = array<i32>} : memref<1x4x8x8xf32, #tpu.memory_space<vmem>>, vector<1x1x8x8xf32>,
    %c2_114 = arith.constant 2 : index
    %c0_115 = arith.constant 0 : index
    %c0_116 = arith.constant 0 : index
    %106 = vector.load %arg9[%c2_114, %c0_115, %c0_116] : memref<4x32x8xf32, #tpu.memory_space<vmem>>, vector<1x32x8xf32>
    %107 = vector.shape_cast %106 : vector<1x32x8xf32> to vector<32x8xf32>
    %cst_117 = arith.constant dense<0.000000e+00> : vector<8x8xf32>
    %108 = tpu.matmul %85, %107, %cst_117 {dimension_numbers = #tpu.dot_dimension_numbers<[1], [0], [0], [1], [0, 0, 1, 1], [], []>} : vector<8x32xf32>, vector<32x8xf32>, vector<8x8xf32> -> vector<8x8xf32>
    %c2_118 = arith.constant 2 : index
    %c0_119 = arith.constant 0 : index
    %c0_120 = arith.constant 0 : index
    %109 = vector.load %arg10[%c2_118, %c0_119, %c0_120] : memref<4x1x8xf32, #tpu.memory_space<vmem>>, vector<1x1x8xf32>
    %110 = vector.shape_cast %109 : vector<1x1x8xf32> to vector<1x8xf32>
    %111 = vector.broadcast %110 : vector<1x8xf32> to vector<8x8xf32>
    %112 = arith.addf %108, %111 : vector<8x8xf32>
    %c0_121 = arith.constant 0 : index
    %c2_122 = arith.constant 2 : index
    %c0_123 = arith.constant 0 : index
    %c0_124 = arith.constant 0 : index
    %113 = vector.load %arg13[%c0_121, %c2_122, %c0_123, %c0_124] : memref<1x4x8x8xf32, #tpu.memory_space<vmem>>, vector<1x1x8x8xf32>
    %114 = vector.shape_cast %113 : vector<1x1x8x8xf32> to vector<8x8xf32>
    %115 = vector.shape_cast %112 : vector<8x8xf32> to vector<1x1x8x8xf32>
    tpu.vector_store %arg13[%c0_121, %c2_122, %c0_123, %c0_124], %115 {strides = array<i32>} : memref<1x4x8x8xf32, #tpu.memory_space<vmem>>, vector<1x1x8x8xf32>,
    %c3_125 = arith.constant 3 : index
    %c0_126 = arith.constant 0 : index
    %c0_127 = arith.constant 0 : index
    %116 = vector.load %arg9[%c3_125, %c0_126, %c0_127] : memref<4x32x8xf32, #tpu.memory_space<vmem>>, vector<1x32x8xf32>
    %117 = vector.shape_cast %116 : vector<1x32x8xf32> to vector<32x8xf32>
    %cst_128 = arith.constant dense<0.000000e+00> : vector<8x8xf32>
    %118 = tpu.matmul %85, %117, %cst_128 {dimension_numbers = #tpu.dot_dimension_numbers<[1], [0], [0], [1], [0, 0, 1, 1], [], []>} : vector<8x32xf32>, vector<32x8xf32>, vector<8x8xf32> -> vector<8x8xf32>
    %c3_129 = arith.constant 3 : index
    %c0_130 = arith.constant 0 : index
    %c0_131 = arith.constant 0 : index
    %119 = vector.load %arg10[%c3_129, %c0_130, %c0_131] : memref<4x1x8xf32, #tpu.memory_space<vmem>>, vector<1x1x8xf32>
    %120 = vector.shape_cast %119 : vector<1x1x8xf32> to vector<1x8xf32>
    %121 = vector.broadcast %120 : vector<1x8xf32> to vector<8x8xf32>
    %122 = arith.addf %118, %121 : vector<8x8xf32>
    %c0_132 = arith.constant 0 : index
    %c3_133 = arith.constant 3 : index
    %c0_134 = arith.constant 0 : index
    %c0_135 = arith.constant 0 : index
    %123 = vector.load %arg13[%c0_132, %c3_133, %c0_134, %c0_135] : memref<1x4x8x8xf32, #tpu.memory_space<vmem>>, vector<1x1x8x8xf32>
    %124 = vector.shape_cast %123 : vector<1x1x8x8xf32> to vector<8x8xf32>
    %125 = vector.shape_cast %122 : vector<8x8xf32> to vector<1x1x8x8xf32>
    tpu.vector_store %arg13[%c0_132, %c3_133, %c0_134, %c0_135], %125 {strides = array<i32>} : memref<1x4x8x8xf32, #tpu.memory_space<vmem>>, vector<1x1x8x8xf32>,
    return
  }
  func.func @transform_0(%arg0: i32, %arg1: i32) -> (i32, i32, i32) {
    %c0_i32 = arith.constant 0 : i32
    %c0_i32_0 = arith.constant 0 : i32
    return %arg0, %arg1, %c0_i32 : i32, i32, i32
  }
  func.func @transform_1(%arg0: i32, %arg1: i32) -> (i32, i32, i32) {
    %c0_i32 = arith.constant 0 : i32
    %c0_i32_0 = arith.constant 0 : i32
    return %arg0, %arg1, %c0_i32 : i32, i32, i32
  }
  func.func @transform_2(%arg0: i32, %arg1: i32) -> (i32, i32, i32) {
    %c0_i32 = arith.constant 0 : i32
    %c0_i32_0 = arith.constant 0 : i32
    return %arg0, %arg1, %c0_i32 : i32, i32, i32
  }
  func.func @transform_3(%arg0: i32, %arg1: i32) -> (i32, i32, i32) {
    %c0_i32 = arith.constant 0 : i32
    %c0_i32_0 = arith.constant 0 : i32
    %c0_i32_1 = arith.constant 0 : i32
    %c0_i32_2 = arith.constant 0 : i32
    return %c0_i32, %c0_i32_0, %c0_i32_1 : i32, i32, i32
  }
  func.func @transform_4(%arg0: i32, %arg1: i32) -> (i32, i32, i32) {
    %c0_i32 = arith.constant 0 : i32
    %c0_i32_0 = arith.constant 0 : i32
    %c0_i32_1 = arith.constant 0 : i32
    %c0_i32_2 = arith.constant 0 : i32
    return %c0_i32, %c0_i32_0, %c0_i32_1 : i32, i32, i32
  }
  func.func @transform_5(%arg0: i32, %arg1: i32) -> (i32, i32, i32) {
    %c0_i32 = arith.constant 0 : i32
    %c0_i32_0 = arith.constant 0 : i32
    %c0_i32_1 = arith.constant 0 : i32
    %c0_i32_2 = arith.constant 0 : i32
    return %c0_i32, %c0_i32_0, %c0_i32_1 : i32, i32, i32
  }
  func.func @transform_6(%arg0: i32, %arg1: i32) -> (i32, i32, i32) {
    %c0_i32 = arith.constant 0 : i32
    %c0_i32_0 = arith.constant 0 : i32
    %c0_i32_1 = arith.constant 0 : i32
    %c0_i32_2 = arith.constant 0 : i32
    return %c0_i32, %c0_i32_0, %c0_i32_1 : i32, i32, i32
  }
  func.func @transform_7(%arg0: i32, %arg1: i32) -> (i32, i32, i32) {
    %c0_i32 = arith.constant 0 : i32
    %c0_i32_0 = arith.constant 0 : i32
    %c0_i32_1 = arith.constant 0 : i32
    %c0_i32_2 = arith.constant 0 : i32
    return %c0_i32, %c0_i32_0, %c0_i32_1 : i32, i32, i32
  }
  func.func @transform_8(%arg0: i32, %arg1: i32) -> (i32, i32, i32) {
    %c0_i32 = arith.constant 0 : i32
    %c0_i32_0 = arith.constant 0 : i32
    %c0_i32_1 = arith.constant 0 : i32
    %c0_i32_2 = arith.constant 0 : i32
    return %c0_i32, %c0_i32_0, %c0_i32_1 : i32, i32, i32
  }
  func.func @transform_9(%arg0: i32, %arg1: i32) -> (i32, i32, i32, i32) {
    %c0_i32 = arith.constant 0 : i32
    %c0_i32_0 = arith.constant 0 : i32
    %c0_i32_1 = arith.constant 0 : i32
    return %arg0, %c0_i32, %arg1, %c0_i32_0 : i32, i32, i32, i32
  }
  func.func @transform_10(%arg0: i32, %arg1: i32) -> (i32, i32, i32, i32) {
    %c0_i32 = arith.constant 0 : i32
    %c0_i32_0 = arith.constant 0 : i32
    %c0_i32_1 = arith.constant 0 : i32
    return %arg0, %c0_i32, %arg1, %c0_i32_0 : i32, i32, i32, i32
  }
  func.func @transform_11(%arg0: i32, %arg1: i32) -> (i32, i32, i32, i32) {
    %c0_i32 = arith.constant 0 : i32
    %c0_i32_0 = arith.constant 0 : i32
    %c0_i32_1 = arith.constant 0 : i32
    return %arg0, %c0_i32, %arg1, %c0_i32_0 : i32, i32, i32, i32
  }
}

</mosaic_0001>

<bundles_post_ra>
// kernel: tpu_custom_call.1
= control target key start
LH: loop header
LB: loop body
LE: loop exit
PB: predicated region body
PF: predicated region fallthrough
CT: control target
= control target key end

     0   :  { %s2852_s0 = inlined_call_operand.vmem [shape: f32[2,8,32], index: 0, kind: input, shape index: {}]   ;;  %s2853_s1 = inlined_call_operand.vmem [shape: f32[2,8,32], index: 1, kind: input, shape index: {}]   ;;  %s2854_s2 = inlined_call_operand.vmem [shape: f32[2,8,32], index: 2, kind: input, shape index: {}]   ;;  %s2855_s3 = inlined_call_operand.vmem [shape: f32[4,32,8], index: 3, kind: input, shape index: {}]   ;;  %s2856_s4 = inlined_call_operand.vmem [shape: f32[4,1,8], index: 4, kind: input, shape index: {}]   ;;  %s2857_s5 = inlined_call_operand.vmem [shape: f32[4,32,8], index: 5, kind: input, shape index: {}]   ;;  %s2858_s6 = inlined_call_operand.vmem [shape: f32[4,1,8], index: 6, kind: input, shape index: {}]   ;;  %s2859_s7 = inlined_call_operand.vmem [shape: f32[4,32,8], index: 7, kind: input, shape index: {}]   ;;  %s2860_s8 = inlined_call_operand.vmem [shape: f32[4,1,8], index: 8, kind: input, shape index: {}]   ;;  %s2861_s9 = inlined_call_operand.hbm [shape: f32[2,4,8,8], index: 9, kind: output, shape index: {0}]   ;;  %s2862_s10 = inlined_call_operand.hbm [shape: f32[2,4,8,8], index: 10, kind: output, shape index: {1}]   ;;  %s2863_s11 = inlined_call_operand.hbm [shape: f32[2,4,8,8], index: 11, kind: output, shape index: {2}]  }
   0x1   :  { %2872 = sst [smem:[#allocation11_spill]] %s2852_s0 }
   0x2   :  { %2873 = sst [smem:[#allocation12_spill]] %s2853_s1 }
   0x3   :  { %17 = vsyncpa [#allocation3], 0 }
   0x4   :  { %19 = vsyncpa [#allocation3 + $0x1], 0 }
   0x5   :  { %20 = vsyncpa [#allocation5], 0 }
   0x6   :  { %22 = vsyncpa [#allocation5 + $0x1], 0  ;;  %s2384_s17 = smov 0   ;;  %s2386_s18 = smov 0  }
   0x7   :  { %s2388_s19 = smov 0   ;;  %s2390_s20 = smov 0  }
   0x8   :  { %s2392_s21 = smov 0   ;;  %s2394_s22 = smov 0  }
   0x9 LB: > { %2874 = sst [smem:[#allocation9_spill]] %s2310_s21  ;;  %s2865_s23 = sadd.s32 4294967295, %s2314_s22   ;;  %s2314_s22 = sphi %s2394_s22, %s28_s22   ;;  %s2310_s21 = sphi %s2392_s21, %s2887_s21   ;;  %s2306_s20 = sphi %s2390_s20, %s2886_s20   ;;  %s2302_s19 = sphi %s2388_s19, %s2890_s19   ;;  %s2298_s18 = sphi %s2386_s18, %s2889_s18   ;;  %s2294_s17 = sphi %s2384_s17, %s2888_s17  }
   0xa   : > { %s2864_s24 = sadd.s32 4294967294, %s2314_s22   ;;  %s40_s25 = sadd.s32 1, %s2310_s21 }
   0xb   : > { %s259_s26 = sadd.s32 1, %s2302_s19  ;;  %p42_p0 = scmp.ge.s32.totalorder %s40_s25, 2 }
   0xc   : > { %p269_p1 = scmp.ne.s32.totalorder %s2302_s19, %s2298_s18  ;;  %p270_p2 = scmp.eq.s32.totalorder %s2865_s23, 1 }
   0xd   : > { %p275_p3 = scmp.ne.s32.totalorder %s2298_s18, %s2294_s17  ;;  %s2892_s25 = smov (%p42_p0, %s40_s25), 0 }
   0xe   : > { %2875 = sst [smem:[#allocation10_spill]] %s2892_s25  ;;  %p2426_p4 = por %p270_p2, %p269_p1 }
   0xf   : > { %p276_p5 = scmp.eq.s32.totalorder %s2864_s24, 1  ;;  %s254_s28 = ssub.s32 %s2310_s21, %s2892_s25 }
  0x10   : > { %p1743_p6 = scmp.ge.s32.totalorder %s2314_s22, 1  ;;  %p257_p7 = scmp.eq.s32.totalorder %s254_s28, 0 }
  0x11   : > { %p2435_p8 = por %p276_p5, %p275_p3  ;;  %p398_p9 = scmp.lt.s32.totalorder %s2314_s22, 3 }
  0x12   : > { %s2441_s30 = scalar_select %p257_p7, %s2302_s19, %s259_s26  }
  0x13   : > { %p399_p10 = pnand %p1743_p6, %p398_p9 }
  0x14   : > { %v486_v0 = vld [vmem:[%s2855_s3] sm:$0xff] (!%p399_p10)  ;;  %v487_v1 = vld [vmem:[%s2855_s3 + $0x8] sm:$0xff] (!%p399_p10)  ;;  %v2316_v3 = vmov (!%p399_p10), 0.0|0.0   ;;  %v488_v6 = vld [vmem:[%s2855_s3 + $0x10] sm:$0xff] (!%p399_p10)  ;;  %p464_p11 = scmp.lt.s32.totalorder (!%p399_p10), %s2306_s20, 1  ;;  %vm2317_vm0 = vmmov (!%p399_p10), 0  }
  0x15   : > { %402 = sbr.rel (%p399_p10) target bundleno = 321 (0x141), region = 56  ;;  %v1752_v2 = vld [vmem:[%s2855_s3 + $0x20] sm:$0xff] (!%p399_p10)  ;;  %2034 = vmatprep.subr.bf16.mxu0 (!%p399_p10), %v2316_v3  ;;  %2040 = vmatprep.subr.bf16.mxu1 (!%p399_p10), %v2316_v3  ;;  %v2035_v4 = vpack.c.bf16 (!%p399_p10), %v487_v1, %v486_v0  ;;  %v1753_v5 = vld [vmem:[%s2855_s3 + $0x28] sm:$0xff] (!%p399_p10)  ;;  %v489_v7 = vld [vmem:[%s2855_s3 + $0x18] sm:$0xff] (!%p399_p10)  ;;  %v2318_v11 = vmov (!%p399_p10), 0.0   ;;  %s2878_s0 = sld [smem:[#allocation11_spill]] (!%p399_p10) }
  0x16   : > { %v2041_v8 = vpack.c.bf16 (!%p399_p10), %v1753_v5, %v1752_v2  ;;  %v1754_v9 = vld [vmem:[%s2855_s3 + $0x30] sm:$0xff] (!%p399_p10)  ;;  %v1755_v10 = vld [vmem:[%s2855_s3 + $0x38] sm:$0xff] (!%p399_p10)  ;;  %1910 = vmatprep.mubr.msk.f32.mxu0 (!%p399_p10), %vm2317_vm0, %v2318_v11  ;;  %1921 = vmatprep.mubr.msk.f32.mxu1 (!%p399_p10), %vm2317_vm0, %v2318_v11  ;;  %v2038_v12 = vpack.c.bf16 (!%p399_p10), %v489_v7, %v488_v6  ;;  %v1760_v14 = vld [vmem:[%s2855_s3 + $0x40] sm:$0xff] (!%p399_p10)  ;;  %vm497_vm1 = vcmask (!%p399_p10), 261120   ;;  %s2879_s1 = sld [smem:[#allocation12_spill]] (!%p399_p10)  ;;  %s447_s26 = sand.u32 (!%p399_p10), 1, %s2298_s18  }
  0x17   : > { %2036 = vmatpush3.bf16.msra.mxu0 (!%p399_p10), %v2035_v4  ;;  %v2044_v13 = vpack.c.bf16 (!%p399_p10), %v1755_v10, %v1754_v9  ;;  %v1761_v15 = vld [vmem:[%s2855_s3 + $0x48] sm:$0xff] (!%p399_p10)  ;;  %v1768_v16 = vld [vmem:[%s2855_s3 + $0x60] sm:$0xff] (!%p399_p10)  ;;  %v1762_v21 = vld [vmem:[%s2855_s3 + $0x50] sm:$0xff] (!%p399_p10)  ;;  %vm571_vm2 = vcmask (!%p399_p10), 64512   ;;  %s2319_s28 = smov (!%p399_p10), [#allocation2]  }
  0x18   : > { %2042 = vmatpush3.bf16.msra.mxu1 (!%p399_p10), %v2041_v8  ;;  %2037 = vmatprep.subr.bf16.mxu0 (!%p399_p10), %v2316_v3  ;;  %v1769_v17 = vld [vmem:[%s2855_s3 + $0x68] sm:$0xff] (!%p399_p10)  ;;  %v2047_v19 = vpack.c.bf16 (!%p399_p10), %v1761_v15, %v1760_v14  ;;  %v1763_v22 = vld [vmem:[%s2855_s3 + $0x58] sm:$0xff] (!%p399_p10)  ;;  %v1770_v23 = vld [vmem:[%s2855_s3 + $0x70] sm:$0xff] (!%p399_p10) }
  0x19   : > { %2043 = vmatprep.subr.bf16.mxu1 (!%p399_p10), %v2316_v3  ;;  %v2053_v20 = vpack.c.bf16 (!%p399_p10), %v1769_v17, %v1768_v16  ;;  %v1771_v24 = vld [vmem:[%s2855_s3 + $0x78] sm:$0xff] (!%p399_p10)  ;;  %v2050_v25 = vpack.c.bf16 (!%p399_p10), %v1763_v22, %v1762_v21  ;;  %v829_v27 = vld [vmem:[%s2857_s5] sm:$0xff] (!%p399_p10)  ;;  %v830_v28 = vld [vmem:[%s2857_s5 + $0x8] sm:$0xff] (!%p399_p10) }
  0x1a   : > { %v2056_v26 = vpack.c.bf16 (!%p399_p10), %v1771_v24, %v1770_v23  ;;  %v1778_v29 = vld [vmem:[%s2857_s5 + $0x20] sm:$0xff] (!%p399_p10)  ;;  %v1779_v30 = vld [vmem:[%s2857_s5 + $0x28] sm:$0xff] (!%p399_p10)  ;;  %v2059_v31 = vpack.c.bf16 (!%p399_p10), %v830_v28, %v829_v27  ;;  %v831_v33 = vld [vmem:[%s2857_s5 + $0x10] sm:$0xff] (!%p399_p10) }
  0x1b   : > { %2039 = vmatpush3.bf16.msra.mxu0 (!%p399_p10), %v2038_v12  ;;  %v2065_v32 = vpack.c.bf16 (!%p399_p10), %v1779_v30, %v1778_v29  ;;  %v832_v34 = vld [vmem:[%s2857_s5 + $0x18] sm:$0xff] (!%p399_p10)  ;;  %v1780_v35 = vld [vmem:[%s2857_s5 + $0x30] sm:$0xff] (!%p399_p10)  ;;  %v1786_v39 = vld [vmem:[%s2857_s5 + $0x40] sm:$0xff] (!%p399_p10) }
  0x1c   : > { %s465_s24 = scalar_select %p464_p11, %s2306_s20, 1  ;;  %2045 = vmatpush3.bf16.msra.mxu1 %v2044_v13  ;;  %2046 = vmatprep.subr.bf16.mxu0 %v2316_v3  ;;  %v1781_v36 = vld [vmem:[%s2857_s5 + $0x38] sm:$0xff]  ;;  %v2062_v37 = vpack.c.bf16 %v832_v34, %v831_v33  ;;  %v1787_v40 = vld [vmem:[%s2857_s5 + $0x48] sm:$0xff]  ;;  %v1794_v41 = vld [vmem:[%s2857_s5 + $0x60] sm:$0xff] }
  0x1d   : > { %2052 = vmatprep.subr.bf16.mxu1 %v2316_v3  ;;  %v2068_v38 = vpack.c.bf16 %v1781_v36, %v1780_v35  ;;  %v1795_v42 = vld [vmem:[%s2857_s5 + $0x68] sm:$0xff]  ;;  %v2071_v44 = vpack.c.bf16 %v1787_v40, %v1786_v39  ;;  %v1788_v46 = vld [vmem:[%s2857_s5 + $0x50] sm:$0xff]  ;;  %v1789_v47 = vld [vmem:[%s2857_s5 + $0x58] sm:$0xff] }
  0x1e   : > { %s2483_s13 = sshll.u32 %s465_s24, 3  ;;  %v2077_v45 = vpack.c.bf16 %v1795_v42, %v1794_v41  ;;  %v1796_v48 = vld [vmem:[%s2857_s5 + $0x70] sm:$0xff]  ;;  %v1797_v49 = vld [vmem:[%s2857_s5 + $0x78] sm:$0xff]  ;;  %v2074_v50 = vpack.c.bf16 %v1789_v47, %v1788_v46  ;;  %v1170_v52 = vld [vmem:[%s2859_s7] sm:$0xff]  ;;  %s2180_s24 = sshll.u32 %s2319_s28, 4  ;;  %s2181_s24 = int_to_ptr.vmem [resolvable:$false] %s2180_s24 }
  0x1f   : > { %s470_s12 = scalar_lea.vmem %s2878_s0, %s2483_s13  ;;  %s477_s16 = scalar_lea.vmem %s2879_s1, %s2483_s13  ;;  %v2080_v51 = vpack.c.bf16 %v1797_v49, %v1796_v48  ;;  %v1171_v53 = vld [vmem:[%s2859_s7 + $0x8] sm:$0xff]  ;;  %v1804_v54 = vld [vmem:[%s2859_s7 + $0x20] sm:$0xff]  ;;  %v1172_v58 = vld [vmem:[%s2859_s7 + $0x10] sm:$0xff] }
  0x20   : > { %v485_v18 = vld [vmem:[%s470_s12] sm:$0xff]  ;;  %v1805_v55 = vld [vmem:[%s2859_s7 + $0x28] sm:$0xff]  ;;  %v2083_v56 = vpack.c.bf16 %v1171_v53, %v1170_v52  ;;  %v1173_v59 = vld [vmem:[%s2859_s7 + $0x18] sm:$0xff]  ;;  %s2664_s12 = sshll.u32 %s447_s26, 5  ;;  %s2182_s0 = scalar_lea.vmem %s2181_s24, 1024 }
  0x21   : > { %1911 = vmatmul.mubr.msk.f32.vlgmr.msra.gmra.mrb[0].mxu0 %vm497_vm1, %v485_v18  ;;  %1922 = vmatmul.mubr.msk.f32.vlgmr.msra.gmra.mrb[0].mxu1 %vm497_vm1, %v485_v18  ;;  %v828_v43 = vld [vmem:[%s477_s16] sm:$0xff]  ;;  %v2089_v57 = vpack.c.bf16 %v1805_v55, %v1804_v54  ;;  %v1806_v60 = vld [vmem:[%s2859_s7 + $0x30] sm:$0xff]  ;;  %v1807_v61 = vld [vmem:[%s2859_s7 + $0x38] sm:$0xff]  ;;  %v2086_v62 = vpack.c.bf16 %v1173_v59, %v1172_v58  ;;  %s484_s16 = scalar_lea.vmem %s2854_s2, %s2483_s13  ;;  %s449_s14 = scalar_lea.vmem [#allocation2], %s2664_s12 }
  0x22   : > { %2048 = vmatpush3.bf16.msra.mxu0 %v2047_v19  ;;  %2054 = vmatpush3.bf16.msra.mxu1 %v2053_v20  ;;  %v2092_v63 = vpack.c.bf16 %v1807_v61, %v1806_v60  ;;  %v1812_v0 = vld [vmem:[%s2859_s7 + $0x40] sm:$0xff]  ;;  %v1813_v1 = vld [vmem:[%s2859_s7 + $0x48] sm:$0xff]  ;;  %v1814_v8 = vld [vmem:[%s2859_s7 + $0x50] sm:$0xff]  ;;  %s1535_s21 = sshll.u32 %s449_s14, 4  ;;  %s2682_s13 = sshll.u32 %s2306_s20, 9  ;;  %s2684_s21 = int_to_ptr.vmem [resolvable:$true] %s1535_s21 }
  0x23   : > { %2049 = vmatprep.subr.bf16.mxu0 %v2316_v3  ;;  %2055 = vmatprep.subr.bf16.mxu1 %v2316_v3  ;;  %v1820_v2 = vld [vmem:[%s2859_s7 + $0x60] sm:$0xff]  ;;  %v1821_v4 = vld [vmem:[%s2859_s7 + $0x68] sm:$0xff]  ;;  %v2095_v6 = vpack.c.bf16 %v1813_v1, %v1812_v0  ;;  %v1815_v9 = vld [vmem:[%s2859_s7 + $0x58] sm:$0xff]  ;;  %s2690_s15 = scalar_lea.hbm %s2861_s9, %s2682_s13  ;;  %s2694_s20 = scalar_lea.sflag [#allocation3], %s447_s26 }
  0x24   : > { %1932 = vmatprep.mubr.msk.f32.mxu0 %vm2317_vm0, %v2318_v11  ;;  %1943 = vmatprep.mubr.msk.f32.mxu1 %vm2317_vm0, %v2318_v11  ;;  %v1169_v5 = vld [vmem:[%s484_s16] sm:$0xff]  ;;  %v2101_v7 = vpack.c.bf16 %v1821_v4, %v1820_v2  ;;  %v1822_v10 = vld [vmem:[%s2859_s7 + $0x70] sm:$0xff]  ;;  %v1823_v12 = vld [vmem:[%s2859_s7 + $0x78] sm:$0xff]  ;;  %v2098_v13 = vpack.c.bf16 %v1815_v9, %v1814_v8  ;;  %s2176_s16 = scalar_lea.vmem %s2684_s21, 512  ;;  %p2183_p1 = scmp.lt.s32.totalorder %s2684_s21, %s2181_s24 }
  0x25   : > { %v2104_v14 = vpack.c.bf16 %v1823_v12, %v1822_v10  ;;  %v1757_v15 = vld [vmem:[%s2856_s4 + $0x1] ss:$0 sm:$0xff]  ;;  %v1765_v21 = vld [vmem:[%s2856_s4 + $0x2] ss:$0 sm:$0xff]  ;;  %v1773_v22 = vld [vmem:[%s2856_s4 + $0x3] ss:$0 sm:$0xff]  ;;  %p2177_p12 = scmp.ne.s32.totalorder %s2684_s21, %s2176_s16  ;;  %p2184_p2 = scmp.lt.s32.totalorder %s2182_s0, %s2176_s16 }
  0x26   : > { %2051 = vmatpush3.bf16.msra.mxu0 %v2050_v25  ;;  %2057 = vmatpush3.bf16.msra.mxu1 %v2056_v26 }
  0x27   : > { %2058 = vmatprep.subr.bf16.mxu0 %v2316_v3  ;;  %2064 = vmatprep.subr.bf16.mxu1 %v2316_v3  ;;  %p2178_p13 = pnand %p2177_p12, %p2426_p4  ;;  %p2185_p3 = por %p2184_p2, %p2183_p1 }
  0x29   : > { %1933 = vmatmul.mubr.msk.f32.vlgmr.msra.gmra.mrb[2].mxu0 %vm497_vm1, %v485_v18  ;;  %1944 = vmatmul.mubr.msk.f32.vlgmr.msra.gmra.mrb[2].mxu1 %vm497_vm1, %v485_v18  ;;  %p2179_p0 = pneg %p2178_p13 }
  0x2a   : > { %2060 = vmatpush3.bf16.msra.mxu0 %v2059_v31  ;;  %2066 = vmatpush3.bf16.msra.mxu1 %v2065_v32 }
  0x2b   : > { %2061 = vmatprep.subr.bf16.mxu0 %v2316_v3  ;;  %2067 = vmatprep.subr.bf16.mxu1 %v2316_v3  ;;  %p2186_p5 = pnand %p2185_p3, %p2179_p0 }
  0x2c   : > { %1954 = vmatprep.mubr.msk.f32.mxu0 %vm2317_vm0, %v2318_v11  ;;  %1965 = vmatprep.mubr.msk.f32.mxu1 %vm2317_vm0, %v2318_v11 }
  0x2e   : > { %2063 = vmatpush3.bf16.msra.mxu0 %v2062_v37  ;;  %2069 = vmatpush3.bf16.msra.mxu1 %v2068_v38 }
  0x2f   : > { %2070 = vmatprep.subr.bf16.mxu0 %v2316_v3  ;;  %2076 = vmatprep.subr.bf16.mxu1 %v2316_v3 }
  0x31   : > { %1955 = vmatmul.mubr.msk.f32.vlgmr.msra.gmra.mrb[4].mxu0 %vm497_vm1, %v828_v43  ;;  %1966 = vmatmul.mubr.msk.f32.vlgmr.msra.gmra.mrb[4].mxu1 %vm497_vm1, %v828_v43 }
  0x32   : > { %2072 = vmatpush3.bf16.msra.mxu0 %v2071_v44  ;;  %2078 = vmatpush3.bf16.msra.mxu1 %v2077_v45 }
  0x33   : > { %2073 = vmatprep.subr.bf16.mxu0 %v2316_v3  ;;  %2079 = vmatprep.subr.bf16.mxu1 %v2316_v3 }
  0x34   : > { %1976 = vmatprep.mubr.msk.f32.mxu0 %vm2317_vm0, %v2318_v11  ;;  %1987 = vmatprep.mubr.msk.f32.mxu1 %vm2317_vm0, %v2318_v11 }
  0x36   : > { %2075 = vmatpush3.bf16.msra.mxu0 %v2074_v50  ;;  %2081 = vmatpush3.bf16.msra.mxu1 %v2080_v51 }
  0x37   : > { %2082 = vmatprep.subr.bf16.mxu0 %v2316_v3  ;;  %2088 = vmatprep.subr.bf16.mxu1 %v2316_v3 }
  0x39   : > { %1977 = vmatmul.mubr.msk.f32.vlgmr.msra.gmra.mrb[6].mxu0 %vm497_vm1, %v828_v43  ;;  %1988 = vmatmul.mubr.msk.f32.vlgmr.msra.gmra.mrb[6].mxu1 %vm497_vm1, %v828_v43 }
  0x3a   : > { %2084 = vmatpush3.bf16.msra.mxu0 %v2083_v56  ;;  %2090 = vmatpush3.bf16.msra.mxu1 %v2089_v57 }
  0x3b   : > { %2085 = vmatprep.subr.bf16.mxu0 %v2316_v3  ;;  %2091 = vmatprep.subr.bf16.mxu1 %v2316_v3 }
  0x3c   : > { %1998 = vmatprep.mubr.msk.f32.mxu0 %vm2317_vm0, %v2318_v11  ;;  %2009 = vmatprep.mubr.msk.f32.mxu1 %vm2317_vm0, %v2318_v11 }
  0x3e   : > { %2087 = vmatpush3.bf16.msra.mxu0 %v2086_v62  ;;  %2093 = vmatpush3.bf16.msra.mxu1 %v2092_v63 }
  0x3f   : > { %2094 = vmatprep.subr.bf16.mxu0 %v2316_v3  ;;  %2100 = vmatprep.subr.bf16.mxu1 %v2316_v3 }
  0x41   : > { %1999 = vmatmul.mubr.msk.f32.vlgmr.msra.gmra.mrb[8].mxu0 %vm497_vm1, %v1169_v5  ;;  %2010 = vmatmul.mubr.msk.f32.vlgmr.msra.gmra.mrb[8].mxu1 %vm497_vm1, %v1169_v5 }
  0x42   : > { %2096 = vmatpush3.bf16.msra.mxu0 %v2095_v6  ;;  %2102 = vmatpush3.bf16.msra.mxu1 %v2101_v7 }
  0x43   : > { %2097 = vmatprep.subr.bf16.mxu0 %v2316_v3  ;;  %2103 = vmatprep.subr.bf16.mxu1 %v2316_v3  ;;  %v1750_v3 = vld [vmem:[%s2856_s4] ss:$0 sm:$0xff] }
  0x44   : > { %2020 = vmatprep.mubr.msk.f32.mxu0 %vm2317_vm0, %v2318_v11  ;;  %2031 = vmatprep.mubr.msk.f32.mxu1 %vm2317_vm0, %v2318_v11 }
  0x46   : > { %2099 = vmatpush3.bf16.msra.mxu0 %v2098_v13  ;;  %2105 = vmatpush3.bf16.msra.mxu1 %v2104_v14 }
  0x49   : > { %2021 = vmatmul.mubr.msk.f32.vlgmr.msra.gmra.mrb[10].mxu0 %vm497_vm1, %v1169_v5  ;;  %2032 = vmatmul.mubr.msk.f32.vlgmr.msra.gmra.mrb[10].mxu1 %vm497_vm1, %v1169_v5 }
  0xf4   : > { %v567_v11 = vpop.f32.mrb[0].mxu0  ;;  %v652_v17 = vpop.f32.mrb[0].mxu1 }
  0xf5   : > { %v568_v16 = vadd.f32 %v1750_v3, %v567_v11  ;;  %v1912_v18 = vpop.f32.mrb[1].mxu0  ;;  %v653_v19 = vadd.f32 %v1757_v15, %v652_v17  ;;  %v1923_v20 = vpop.f32.mrb[1].mxu1 }
  0xf7   : > { %572 = vst.msk [vmem:[%s449_s14] sm:$0xff] %vm571_vm2, %v568_v16  ;;  %1759 = vst.msk [vmem:[%s449_s14 + $0x8] sm:$0xff] %vm571_vm2, %v653_v19 }
  0xfc   : > { %v737_v23 = vpop.f32.mrb[2].mxu0  ;;  %v822_v25 = vpop.f32.mrb[2].mxu1 }
  0xfd   : > { %v738_v24 = vadd.f32 %v1765_v21, %v737_v23  ;;  %v1934_v26 = vpop.f32.mrb[3].mxu0  ;;  %v823_v27 = vadd.f32 %v1773_v22, %v822_v25  ;;  %v1945_v28 = vpop.f32.mrb[3].mxu1 }
  0xff   : > { %1767 = vst.msk [vmem:[%s449_s14 + $0x10] sm:$0xff] %vm571_vm2, %v738_v24  ;;  %1775 = vst.msk [vmem:[%s449_s14 + $0x18] sm:$0xff] %vm571_vm2, %v823_v27 }
 0x100   : > { %2189 = shalt.err (!%p2186_p5)
}
 0x101   : > { %s2190_s26 = scalar_lea.hbm %s2690_s15, 512  ;;  %s2194_s25 = scalar_lea.hbm %s2861_s9, 1024 }
 0x102   : > { %p2191_p6 = scmp.ne.s32.totalorder %s2690_s15, %s2190_s26  ;;  %p2195_p10 = scmp.lt.u32.totalorder %s2690_s15, %s2861_s9 }
 0x103   : > { %p2196_p11 = scmp.lt.u32.totalorder %s2194_s25, %s2190_s26  ;;  %p2198_p13 = scmp.lt.u32.totalorder %s2190_s26, %s2690_s15 }
 0x104   : > { %p2192_p7 = pnand %p2191_p6, %p2426_p4 }
 0x105   : > { %p2197_p12 = por %p2196_p11, %p2195_p10 }
 0x106   : > { %p2193_p9 = pneg %p2192_p7 }
 0x107   : > { %p2199_p0 = por %p2198_p13, %p2197_p12 }
 0x109   : > { %p2200_p1 = pnand %p2199_p0, %p2193_p9 }
 0x10b   : > { %2203 = shalt.err (!%p2200_p1)
}
 0x10c   : > { %s2868_s0 = smov 128   ;;  %s2870_s16 = smov 8   ;;  %v1776_v29 = vld [vmem:[%s2858_s6] ss:$0 sm:$0xff]  ;;  %v1783_v30 = vld [vmem:[%s2858_s6 + $0x1] ss:$0 sm:$0xff] }
 0x10d   : > { %2106 = dma.vmem_to_hbm [thread:$0]  (%p2426_p4), %s2684_s21, 512, %s2690_s15, %s2694_s20, %s2868_s0, %s2868_s0, %s2870_s16   ;;  %v909_v31 = vpop.f32.mrb[4].mxu0  ;;  %v993_v33 = vpop.f32.mrb[4].mxu1 }
 0x10e   : > { %v910_v32 = vadd.f32 %v1776_v29, %v909_v31  ;;  %v1956_v34 = vpop.f32.mrb[5].mxu0  ;;  %v994_v35 = vadd.f32 %v1783_v30, %v993_v33  ;;  %v1967_v36 = vpop.f32.mrb[5].mxu1  ;;  %s456_s28 = scalar_lea.vmem [#allocation4], %s2664_s12  ;;  %v1791_v37 = vld [vmem:[%s2858_s6 + $0x2] ss:$0 sm:$0xff]  ;;  %s2880_s23 = sadd.s32 4294967295, %s2314_s22  }
 0x10f   : > { %s1552_s21 = sshll.u32 %s456_s28, 4  ;;  %v1799_v38 = vld [vmem:[%s2858_s6 + $0x3] ss:$0 sm:$0xff]  ;;  %s2738_s26 = sand.u32 1, %s2880_s23   ;;  %v1078_v39 = vpop.f32.mrb[6].mxu0  ;;  %v1163_v41 = vpop.f32.mrb[6].mxu1  ;;  %s2740_s21 = int_to_ptr.vmem [resolvable:$true] %s1552_s21 }
 0x110   : > { %913 = vst.msk [vmem:[%s456_s28] sm:$0xff] %vm571_vm2, %v910_v32  ;;  %1785 = vst.msk [vmem:[%s456_s28 + $0x8] sm:$0xff] %vm571_vm2, %v994_v35  ;;  %v1079_v40 = vadd.f32 %v1791_v37, %v1078_v39  ;;  %v1978_v42 = vpop.f32.mrb[7].mxu0  ;;  %v1164_v43 = vadd.f32 %v1799_v38, %v1163_v41  ;;  %v1989_v44 = vpop.f32.mrb[7].mxu1  ;;  %s2746_s20 = scalar_lea.hbm %s2862_s10, %s2682_s13  ;;  %s2204_s14 = scalar_lea.vmem %s2740_s21, 512 }
 0x111   : > { %p2205_p2 = scmp.ne.s32.totalorder %s2740_s21, %s2204_s14  ;;  %s2322_s23 = smov [#allocation4]  }
 0x112   : > { %1793 = vst.msk [vmem:[%s456_s28 + $0x10] sm:$0xff] %vm571_vm2, %v1079_v40  ;;  %1801 = vst.msk [vmem:[%s456_s28 + $0x18] sm:$0xff] %vm571_vm2, %v1164_v43  ;;  %s2208_s0 = sshll.u32 %s2322_s23, 4  ;;  %s2209_s0 = int_to_ptr.vmem [resolvable:$false] %s2208_s0 }
 0x113   : > { %p2206_p3 = pnand %p2205_p2, %p2426_p4  ;;  %s2210_s16 = scalar_lea.vmem %s2209_s0, 1024 }
 0x114   : > { %p2211_p6 = scmp.lt.s32.totalorder %s2740_s21, %s2209_s0  ;;  %p2212_p7 = scmp.lt.s32.totalorder %s2210_s16, %s2204_s14 }
 0x115   : > { %p2207_p5 = pneg %p2206_p3 }
 0x116   : > { %p2213_p9 = por %p2212_p7, %p2211_p6 }
 0x118   : > { %p2214_p10 = pnand %p2213_p9, %p2207_p5 }
 0x11a   : > { %2217 = shalt.err (!%p2214_p10)
}
 0x11b   : > { %s2218_s28 = scalar_lea.hbm %s2746_s20, 512  ;;  %s2222_s23 = scalar_lea.hbm %s2862_s10, 1024 }
 0x11c   : > { %p2219_p11 = scmp.ne.s32.totalorder %s2746_s20, %s2218_s28  ;;  %p2223_p0 = scmp.lt.u32.totalorder %s2746_s20, %s2862_s10 }
 0x11d   : > { %p2224_p1 = scmp.lt.u32.totalorder %s2222_s23, %s2218_s28  ;;  %p2226_p3 = scmp.lt.u32.totalorder %s2218_s28, %s2746_s20 }
 0x11e   : > { %p2220_p12 = pnand %p2219_p11, %p2426_p4 }
 0x11f   : > { %p2225_p2 = por %p2224_p1, %p2223_p0 }
 0x120   : > { %p2221_p13 = pneg %p2220_p12 }
 0x121   : > { %p2227_p5 = por %p2226_p3, %p2225_p2 }
 0x123   : > { %p2228_p6 = pnand %p2227_p5, %p2221_p13 }
 0x125   : > { %2231 = shalt.err (!%p2228_p6)
}
 0x126   : > { %s2881_s16 = smov 8   ;;  %s2882_s14 = smov 128   ;;  %v1802_v45 = vld [vmem:[%s2860_s8] ss:$0 sm:$0xff]  ;;  %v1809_v46 = vld [vmem:[%s2860_s8 + $0x1] ss:$0 sm:$0xff] }
 0x127   : > { %s2883_s1 = scalar_lea.sflag [#allocation5], %s2738_s26  ;;  %v1250_v47 = vpop.f32.mrb[8].mxu0  ;;  %v1334_v49 = vpop.f32.mrb[8].mxu1  ;;  %s463_s23 = scalar_lea.vmem [#allocation6], %s2664_s12  ;;  %v1817_v53 = vld [vmem:[%s2860_s8 + $0x2] ss:$0 sm:$0xff] }
 0x128   : > { %2107 = dma.vmem_to_hbm [thread:$0]  (%p2426_p4), %s2740_s21, 512, %s2746_s20, %s2883_s1, %s2882_s14, %s2882_s14, %s2881_s16   ;;  %v1251_v48 = vadd.f32 %v1802_v45, %v1250_v47  ;;  %v2000_v50 = vpop.f32.mrb[9].mxu0  ;;  %v1335_v51 = vadd.f32 %v1809_v46, %v1334_v49  ;;  %v2011_v52 = vpop.f32.mrb[9].mxu1 }
 0x129   : > { %s1569_s20 = sshll.u32 %s463_s23, 4  ;;  %v1825_v54 = vld [vmem:[%s2860_s8 + $0x3] ss:$0 sm:$0xff]  ;;  %v1419_v55 = vpop.f32.mrb[10].mxu0  ;;  %v1504_v57 = vpop.f32.mrb[10].mxu1  ;;  %s2798_s15 = scalar_lea.hbm %s2863_s11, %s2682_s13  ;;  %s2792_s20 = int_to_ptr.vmem [resolvable:$true] %s1569_s20 }
 0x12a   : > { %1254 = vst.msk [vmem:[%s463_s23] sm:$0xff] %vm571_vm2, %v1251_v48  ;;  %1811 = vst.msk [vmem:[%s463_s23 + $0x8] sm:$0xff] %vm571_vm2, %v1335_v51  ;;  %v1420_v56 = vadd.f32 %v1817_v53, %v1419_v55  ;;  %v2022_v58 = vpop.f32.mrb[11].mxu0  ;;  %v1505_v59 = vadd.f32 %v1825_v54, %v1504_v57  ;;  %v2033_v60 = vpop.f32.mrb[11].mxu1  ;;  %s2232_s28 = scalar_lea.vmem %s2792_s20, 512  ;;  %s2323_s1 = smov [#allocation6]  }
 0x12b   : > { %p2233_p7 = scmp.ne.s32.totalorder %s2792_s20, %s2232_s28  ;;  %s2236_s21 = sshll.u32 %s2323_s1, 4  ;;  %s2237_s21 = int_to_ptr.vmem [resolvable:$false] %s2236_s21 }
 0x12c   : > { %1819 = vst.msk [vmem:[%s463_s23 + $0x10] sm:$0xff] %vm571_vm2, %v1420_v56  ;;  %1827 = vst.msk [vmem:[%s463_s23 + $0x18] sm:$0xff] %vm571_vm2, %v1505_v59  ;;  %s2238_s0 = scalar_lea.vmem %s2237_s21, 1024  ;;  %p2239_p11 = scmp.lt.s32.totalorder %s2792_s20, %s2237_s21 }
 0x12d   : > { %p2234_p9 = pnand %p2233_p7, %p2426_p4  ;;  %p2240_p12 = scmp.lt.s32.totalorder %s2238_s0, %s2232_s28 }
 0x12f   : > { %p2235_p10 = pneg %p2234_p9  ;;  %p2241_p13 = por %p2240_p12, %p2239_p11 }
 0x131   : > { %p2242_p0 = pnand %p2241_p13, %p2235_p10 }
 0x133   : > { %2245 = shalt.err (!%p2242_p0)
}
 0x134   : > { %s2246_s13 = scalar_lea.hbm %s2798_s15, 512  ;;  %s2250_s12 = scalar_lea.hbm %s2863_s11, 1024 }
 0x135   : > { %p2247_p1 = scmp.ne.s32.totalorder %s2798_s15, %s2246_s13  ;;  %p2251_p5 = scmp.lt.u32.totalorder %s2798_s15, %s2863_s11 }
 0x136   : > { %p2252_p6 = scmp.lt.u32.totalorder %s2250_s12, %s2246_s13  ;;  %p2254_p9 = scmp.lt.u32.totalorder %s2246_s13, %s2798_s15 }
 0x137   : > { %p2248_p2 = pnand %p2247_p1, %p2426_p4 }
 0x138   : > { %p2253_p7 = por %p2252_p6, %p2251_p5 }
 0x139   : > { %p2249_p3 = pneg %p2248_p2 }
 0x13a   : > { %p2255_p10 = por %p2254_p9, %p2253_p7 }
 0x13c   : > { %p2256_p11 = pnand %p2255_p10, %p2249_p3 }
 0x13e   : > { %2259 = shalt.err (!%p2256_p11)
}
 0x13f   : > { %s2884_s28 = scalar_lea.sflag [#allocation5], %s2738_s26 }
 0x140   : > { %2108 = dma.vmem_to_hbm [thread:$0]  (%p2426_p4), %s2792_s20, 512, %s2798_s15, %s2884_s28, %s2882_s14, %s2882_s14, %s2881_s16  }
 0x141 PF: > { %p2122_p12 = scmp.ge.s32.totalorder %s2314_s22, 2  ;;  %s1584_s21 = sand.u32 1, %s2294_s17  }
 0x142   : > { %s1585_s0 = scalar_lea.sflag [#allocation3], %s1584_s21 }
 0x143   : > { %p2113_p13 = pnand %p2122_p12, %p2435_p8 }
 0x145   : > { %2285 = dma.done.wait (!%p2113_p13), %s1585_s0, 512  }
 0x146   : > { %2287 = vsyncadd (!%p2113_p13), %s1585_s0, 4294966784  ;;  %s2885_s27 = sadd.s32 4294967294, %s2314_s22  }
 0x147   : > { %s1593_s13 = sand.u32 1, %s2885_s27  }
 0x148   : > { %s1594_s23 = scalar_lea.sflag [#allocation5], %s1593_s13 }
 0x149   : > { %2289 = dma.done.wait (!%p2113_p13), %s1594_s23, 1024  }
 0x14a   : > { %2291 = vsyncadd (!%p2113_p13), %s1594_s23, 4294966272  ;;  %s28_s22 = sadd.s32 1, %s2314_s22   ;;  %s2886_s20 = sld [smem:[#allocation9_spill]] }
 0x14b   : > { %p25_p4 = scmp.ge.s32.totalorder %s28_s22, 4   ;;  %s2887_s21 = sld [smem:[#allocation10_spill]] }
 0x14c   : > { %s2888_s17 = smov %s2298_s18  ;;  %s2889_s18 = smov %s2302_s19 }
 0x14d   : > { %s2890_s19 = smov %s2441_s30  ;;  %27 = sbr.rel (!%p25_p4) target bundleno = 9 (0x9), region = 156 }
 0x154   :  { %1608 = vsyncpa [#allocation3], 1 }
 0x155   :  { %1610 = vsyncpa [#allocation3 + $0x1], 1 }
 0x156   :  { %1611 = vsyncpa [#allocation5], 1 }
 0x157   :  { %1613 = vsyncpa [#allocation5 + $0x1], 1 }

</bundles_post_ra>
